<compile_context>
chip_gen: v5e
topology: v5e:2x2
jax: 0.10.0
libtpu: 0.0.40
codegen_flags: <defaults>
</compile_context>

<pallas_src>
import jax
import jax.numpy as jnp
from jax.experimental import pallas as pl
from jax.experimental.pallas import tpu as pltpu


def init_rope_tables(d_model, max_len=5000):
    """sin/cos parameter init identical to RotaryChannelEmbeddingLearnable.__init__."""
    assert d_model % 2 == 0, "d_model must be even for ROPE."
    inv_freq = 1.0 / (
        50000.0 ** (jnp.arange(0, d_model, 2, dtype=jnp.float32) / d_model)
    )
    positions = jnp.arange(max_len, dtype=jnp.float32)
    sinusoid = positions[:, None] * inv_freq[None, :]  # (max_len, d_model // 2)
    return jnp.sin(sinusoid), jnp.cos(sinusoid)


def _rope_kernel(x_ref, cos_ref, sin_e_ref, sin_o_ref, o_ref):
    # x_ref / o_ref          : (tile_n, D)  -- one row-tile of the flattened input
    # cos/sin_e/sin_o refs   : (tile_n, D)  -- grid-invariant, phase-aligned slabs
    #   sin_e[i] = -sin[i] on even lanes, 0 on odd lanes
    #   sin_o[i] =  sin[i] on odd lanes,  0 on even lanes
    x = x_ref[...].astype(jnp.float32)
    D = x.shape[1]

    # Circular neighbor access via XLU lane rotation (jnp.roll semantics).
    x_next = pltpu.roll(x, D - 1, axis=1)  # x_next[i] = x[(i + 1) % D]
    x_prev = pltpu.roll(x, 1, axis=1)      # x_prev[i] = x[(i - 1) % D]

    # out[2k]   = x[2k]*c   - x[2k+1]*s      (sin_o is 0 on even lanes)
    # out[2k+1] = x[2k+1]*c + x[2k]*s        (sin_e is 0 on odd lanes)
    out = x * cos_ref[...] + x_next * sin_e_ref[...] + x_prev * sin_o_ref[...]
    o_ref[...] = out.astype(o_ref.dtype)


def rotary_channel_embedding(
    x, sin_embed, cos_embed, *, tile_rows=1792, vmem_budget_bytes=24 << 20
):
    """Forward pass of RotaryChannelEmbeddingLearnable.

    Args:
      x:         (B, L, d_model) array, L must be a multiple of 7, d_model even.
      sin_embed: (max_len, d_model // 2) learnable sin table (rows [:7] used).
      cos_embed: (max_len, d_model // 2) learnable cos table (rows [:7] used).
      tile_rows: target rows per grid step (multiple of 56 after clamping).
      vmem_budget_bytes: soft VMEM cap used to auto-shrink the tile.
    """
    B, L, D = x.shape
    assert D % 2 == 0, "d_model must be even for ROPE."
    assert L % 7 == 0, "seq_len must be a multiple of 7 (as in the PyTorch module)."
    N = B * L

    # (7, D) repeat-interleaved tables, exactly as in the PyTorch forward,
    # with the rotate_half sign/parity folded in.
    sin7 = jnp.repeat(sin_embed[:7].astype(jnp.float32), 2, axis=-1)
    cos7 = jnp.repeat(cos_embed[:7].astype(jnp.float32), 2, axis=-1)
    lane_even = (jnp.arange(D) % 2) == 0
    sin_e7 = jnp.where(lane_even, -sin7, 0.0)  # hits x[i+1] on even lanes
    sin_o7 = jnp.where(lane_even, 0.0, sin7)   # hits x[i-1] on odd lanes

    def _round_up(a, m):
        return ((a + m - 1) // m) * m

    # VMEM per row-block: x + out (double-buffered) + 3 table slabs (2 bufs).
    bytes_per_row = 10 * D * 4
    max_rows = max(56, vmem_budget_bytes // bytes_per_row)
    tile_n = min(tile_rows, max_rows, _round_up(N, 56))
    tile_n = max(56, (tile_n // 56) * 56)  # multiple of lcm(7, 8) = 56

    x2 = x.reshape(N, D)  # contiguous reshape: no copy, no padding pass

    reps = tile_n // 7
    cos_tile = jnp.tile(cos7, (reps, 1))
    sin_e_tile = jnp.tile(sin_e7, (reps, 1))
    sin_o_tile = jnp.tile(sin_o7, (reps, 1))

    grid = (pl.cdiv(N, tile_n),)
    out = pl.pallas_call(
        _rope_kernel,
        out_shape=jax.ShapeDtypeStruct((N, D), x.dtype),
        grid=grid,
        in_specs=[
            pl.BlockSpec((tile_n, D), lambda i: (i, 0)),
            pl.BlockSpec((tile_n, D), lambda i: (0, 0)),  # grid-invariant slabs
            pl.BlockSpec((tile_n, D), lambda i: (0, 0)),
            pl.BlockSpec((tile_n, D), lambda i: (0, 0)),
        ],
        out_specs=pl.BlockSpec((tile_n, D), lambda i: (i, 0)),
        compiler_params=pltpu.CompilerParams(
            dimension_semantics=("parallel",),
        ),
        cost_estimate=pl.CostEstimate(
            flops=5 * N * D,
            transcendentals=0,
            bytes_accessed=(
                N * D * x.dtype.itemsize          # read x
                + N * D * x.dtype.itemsize        # write out
                + 3 * tile_n * D * 4              # grid-invariant tables
            ),
        ),
    )(x2, cos_tile, sin_e_tile, sin_o_tile)

    return out.reshape(B, L, D)


def rotary_channel_embedding_ref(x, sin_embed, cos_embed):
    """Pure-JAX reference matching the PyTorch forward exactly."""
    B, L, D = x.shape
    sin_full = jnp.tile(
        jnp.repeat(sin_embed[:7].astype(jnp.float32), 2, axis=-1)[None], (1, L // 7, 1)
    )
    cos_full = jnp.tile(
        jnp.repeat(cos_embed[:7].astype(jnp.float32), 2, axis=-1)[None], (1, L // 7, 1)
    )
    x_even = -x[..., 1::2]
    x_odd = x[..., 0::2]
    rot = jnp.stack([x_even, x_odd], axis=-1).reshape(B, L, D)
    return x * cos_full + rot * sin_full


if __name__ == "__main__":
    # Small but TPU-friendly shapes: seq_len multiple of 7, d_model = 128
    # (lane-dense output blocks, single grid step in the demo).
    B, L, d_model = 2, 56, 128
    key = jax.random.PRNGKey(0)
    x = jax.random.normal(key, (B, L, d_model), dtype=jnp.float32)

    sin_t, cos_t = init_rope_tables(d_model, max_len=64)

    out = rotary_channel_embedding(x, sin_t, cos_t)
    out = jax.block_until_ready(out)

    ref = rotary_channel_embedding_ref(x, sin_t, cos_t)
    assert out.shape == (B, L, d_model)
    assert jnp.allclose(out, ref, atol=1e-5, rtol=1e-5)
    print("KERNEL_OK")
</pallas_src>

<mosaic_0001>
module attributes {stable_mosaic.version = 11 : i64} {
  func.func @_rope_kernel(%arg0: i32, %arg1: memref<112x128xf32, #tpu.memory_space<vmem>>, %arg2: memref<112x128xf32, #tpu.memory_space<vmem>>, %arg3: memref<112x128xf32, #tpu.memory_space<vmem>>, %arg4: memref<112x128xf32, #tpu.memory_space<vmem>>, %arg5: memref<112x128xf32, #tpu.memory_space<vmem>>) attributes {dimension_semantics = [#tpu.dimension_semantics<parallel>], iteration_bounds = array<i64: 1>, scalar_prefetch = 0 : i64, scratch_operands = 0 : i64, tpu.core_type = #tpu.core_type<tc>, window_params = [{transform_indices = @transform_0, window_bounds = array<i64: 112, 128>}, {pipeline_mode = #tpu.pipeline_mode<synchronous>, transform_indices = @transform_1, window_bounds = array<i64: 112, 128>}, {pipeline_mode = #tpu.pipeline_mode<synchronous>, transform_indices = @transform_2, window_bounds = array<i64: 112, 128>}, {pipeline_mode = #tpu.pipeline_mode<synchronous>, transform_indices = @transform_3, window_bounds = array<i64: 112, 128>}, {transform_indices = @transform_4, window_bounds = array<i64: 112, 128>}]} {
    %c0 = arith.constant 0 : index
    %c0_0 = arith.constant 0 : index
    %0 = vector.load %arg1[%c0, %c0_0] : memref<112x128xf32, #tpu.memory_space<vmem>>, vector<112x128xf32>
    %c127_i32 = arith.constant 127 : i32
    %1 = tpu.dynamic_rotate %0 by %c127_i32 dim 1 : vector<112x128xf32>, i32 -> vector<112x128xf32>
    %c1_i32 = arith.constant 1 : i32
    %2 = tpu.dynamic_rotate %0 by %c1_i32 dim 1 : vector<112x128xf32>, i32 -> vector<112x128xf32>
    %c0_1 = arith.constant 0 : index
    %c0_2 = arith.constant 0 : index
    %3 = vector.load %arg2[%c0_1, %c0_2] : memref<112x128xf32, #tpu.memory_space<vmem>>, vector<112x128xf32>
    %4 = arith.mulf %0, %3 : vector<112x128xf32>
    %c0_3 = arith.constant 0 : index
    %c0_4 = arith.constant 0 : index
    %5 = vector.load %arg3[%c0_3, %c0_4] : memref<112x128xf32, #tpu.memory_space<vmem>>, vector<112x128xf32>
    %6 = arith.mulf %1, %5 : vector<112x128xf32>
    %7 = arith.addf %4, %6 : vector<112x128xf32>
    %c0_5 = arith.constant 0 : index
    %c0_6 = arith.constant 0 : index
    %8 = vector.load %arg4[%c0_5, %c0_6] : memref<112x128xf32, #tpu.memory_space<vmem>>, vector<112x128xf32>
    %9 = arith.mulf %2, %8 : vector<112x128xf32>
    %10 = arith.addf %7, %9 : vector<112x128xf32>
    %c0_7 = arith.constant 0 : index
    %c0_8 = arith.constant 0 : index
    %11 = vector.load %arg5[%c0_7, %c0_8] : memref<112x128xf32, #tpu.memory_space<vmem>>, vector<112x128xf32>
    tpu.vector_store %arg5[%c0_7, %c0_8], %10 {strides = array<i32>} : memref<112x128xf32, #tpu.memory_space<vmem>>, vector<112x128xf32>,
    return
  }
  func.func @transform_0(%arg0: i32) -> (i32, i32) {
    %c0_i32 = arith.constant 0 : i32
    %c0_i32_0 = arith.constant 0 : i32
    return %arg0, %c0_i32 : i32, i32
  }
  func.func @transform_1(%arg0: i32) -> (i32, i32) {
    %c0_i32 = arith.constant 0 : i32
    %c0_i32_0 = arith.constant 0 : i32
    %c0_i32_1 = arith.constant 0 : i32
    return %c0_i32, %c0_i32_0 : i32, i32
  }
  func.func @transform_2(%arg0: i32) -> (i32, i32) {
    %c0_i32 = arith.constant 0 : i32
    %c0_i32_0 = arith.constant 0 : i32
    %c0_i32_1 = arith.constant 0 : i32
    return %c0_i32, %c0_i32_0 : i32, i32
  }
  func.func @transform_3(%arg0: i32) -> (i32, i32) {
    %c0_i32 = arith.constant 0 : i32
    %c0_i32_0 = arith.constant 0 : i32
    %c0_i32_1 = arith.constant 0 : i32
    return %c0_i32, %c0_i32_0 : i32, i32
  }
  func.func @transform_4(%arg0: i32) -> (i32, i32) {
    %c0_i32 = arith.constant 0 : i32
    %c0_i32_0 = arith.constant 0 : i32
    return %arg0, %c0_i32 : i32, i32
  }
}

</mosaic_0001>

<bundles_post_ra>
// kernel: tpu_custom_call.1
= control target key start
LH: loop header
LB: loop body
LE: loop exit
PB: predicated region body
PF: predicated region fallthrough
CT: control target
= control target key end

     0   :  { %9 = vsyncpa [#allocation3], 0  ;;  %s575_s0 = inlined_call_operand.hbm [shape: f32[112,128], index: 0, kind: input, shape index: {}]   ;;  %s576_s1 = inlined_call_operand.hbm [shape: f32[112,128], index: 1, kind: input, shape index: {}]   ;;  %s577_s2 = inlined_call_operand.hbm [shape: f32[112,128], index: 2, kind: input, shape index: {}]   ;;  %s578_s3 = inlined_call_operand.hbm [shape: f32[112,128], index: 3, kind: input, shape index: {}]   ;;  %s579_s4 = inlined_call_operand.hbm [shape: f32[112,128], index: 4, kind: output, shape index: {}]  }
   0x1   :  { %10 = vsyncpa [#allocation6], 0 }
   0x2   :  { %11 = vsyncpa [#allocation9], 0 }
   0x3   :  { %12 = vsyncpa [#allocation4], 0  ;;  %s30_s17 = sshll.u32 %s576_s1, 4  ;;  %s435_s18 = smov [#allocation5]   ;;  %s31_s17 = int_to_ptr.hbm [resolvable:$true] %s30_s17 }
   0x4   :  { %s32_s19 = sshll.u32 %s435_s18, 4  ;;  %s17_s22 = sshll.u32 %s575_s0, 4  ;;  %s33_s19 = int_to_ptr.vmem [resolvable:$true] %s32_s19  ;;  %s18_s22 = int_to_ptr.hbm [resolvable:$true] %s17_s22 }
   0x5   :  { %s436_s23 = smov 128   ;;  %s437_s24 = smov 8  }
   0x6   :  { %38 = dma.hbm_to_vmem [thread:$0]  %s31_s17, 1792, %s33_s19, [#allocation6], %s436_s23, %s436_s23, %s437_s24  }
   0x7   :  { %s438_s25 = smov [#allocation2]   ;;  %s43_s1 = sshll.u32 %s577_s2, 4  ;;  %s44_s1 = int_to_ptr.hbm [resolvable:$true] %s43_s1 }
   0x8   :  { %s19_s26 = sshll.u32 %s438_s25, 4  ;;  %s56_s30 = sshll.u32 %s578_s3, 4  ;;  %s20_s26 = int_to_ptr.vmem [resolvable:$true] %s19_s26  ;;  %s57_s30 = int_to_ptr.hbm [resolvable:$true] %s56_s30 }
   0x9   :  { %25 = dma.hbm_to_vmem [thread:$0]  %s18_s22, 1792, %s20_s26, [#allocation3], %s436_s23, %s436_s23, %s437_s24  }
   0xa   :  { %s439_s5 = smov [#allocation7]   ;;  %s440_s7 = smov [#allocation8]  }
   0xb   :  { %s45_s6 = sshll.u32 %s439_s5, 4  ;;  %s58_s2 = sshll.u32 %s440_s7, 4  ;;  %s46_s6 = int_to_ptr.vmem [resolvable:$true] %s45_s6  ;;  %s59_s2 = int_to_ptr.vmem [resolvable:$true] %s58_s2 }
   0xc   :  { %51 = dma.hbm_to_vmem [thread:$0]  %s44_s1, 1792, %s46_s6, [#allocation6], %s436_s23, %s436_s23, %s437_s24  }
   0xd   :  { %64 = dma.hbm_to_vmem [thread:$0]  %s57_s30, 1792, %s59_s2, [#allocation9], %s436_s23, %s436_s23, %s437_s24  }
   0xe   :  { %427 = dma.done.wait [#allocation3], 1792  }
   0xf   :  { %428 = vsyncadd [#allocation3], 4294965504 }
  0x10   :  { %429 = dma.done.wait [#allocation6], 3584  }
  0x11   :  { %430 = vsyncadd [#allocation6], 4294963712 }
  0x12   :  { %431 = dma.done.wait [#allocation9], 1792  }
  0x13   :  { %432 = vsyncadd [#allocation9], 4294965504  ;;  %v85_v0 = vld [vmem:[#allocation2 + $0x20] sm:$0xff]  ;;  %v493_v1 = vld [vmem:[#allocation2 + $0x10] sm:$0xff]  ;;  %s441_s3 = smov 127   ;;  %s442_s8 = smov 1  }
  0x14   :  { %103 = vrot.lane.b32.xlu2 %v85_v0, %s441_s3  ;;  %99 = vrot.lane.b32.xlu1 %v493_v1, %s441_s3  ;;  %v81_v2 = vld [vmem:[#allocation2] sm:$0xff]  ;;  %v496_v3 = vld [vmem:[#allocation2 + $0x28] sm:$0xff]  ;;  %v84_v4 = vld [vmem:[#allocation2 + $0x18] sm:$0xff]  ;;  %s443_s9 = smov [#allocation10]   ;;  %s283_s13 = sshll.u32 %s579_s4, 4  ;;  %s284_s13 = int_to_ptr.hbm [resolvable:$true] %s283_s13 }
  0x15   :  { %95 = vrot.lane.b32.xlu0 %v81_v2, %s441_s3  ;;  %v498_v5 = vld [vmem:[#allocation2 + $0x8] sm:$0xff]  ;;  %v502_v6 = vld [vmem:[#allocation2 + $0x40] sm:$0xff]  ;;  %v504_v7 = vld [vmem:[#allocation2 + $0x38] sm:$0xff]  ;;  %s281_s10 = sshll.u32 %s443_s9, 4  ;;  %s282_s10 = int_to_ptr.vmem [resolvable:$true] %s281_s10 }
  0x16   :  { %v506_v8 = vld [vmem:[#allocation2 + $0x30] sm:$0xff]  ;;  %v511_v9 = vld [vmem:[#allocation2 + $0x58] sm:$0xff]  ;;  %v515_v11 = vld [vmem:[#allocation2 + $0x48] sm:$0xff] }
  0x17   :  { %v513_v10 = vld [vmem:[#allocation2 + $0x50] sm:$0xff]  ;;  %v520_v12 = vld [vmem:[#allocation2 + $0x68] sm:$0xff]  ;;  %v522_v13 = vld [vmem:[#allocation2 + $0x60] sm:$0xff] }
  0x18   :  { %v155_v14 = vld [vmem:[#allocation5 + $0x20] sm:$0xff]  ;;  %v183_v15 = vld [vmem:[#allocation7 + $0x20] sm:$0xff]  ;;  %v154_v30 = vld [vmem:[#allocation5 + $0x18] sm:$0xff] }
  0x19   :  { %v169_v16 = vmul.f32 %v155_v14, %v85_v0  ;;  %v151_v25 = vld [vmem:[#allocation5] sm:$0xff]  ;;  %v179_v26 = vld [vmem:[#allocation7] sm:$0xff]  ;;  %v182_v31 = vld [vmem:[#allocation7 + $0x18] sm:$0xff]  ;;  %v168_v37 = vmul.f32 %v154_v30, %v84_v4 }
  0x1a   :  { %v165_v27 = vmul.f32 %v151_v25, %v81_v2  ;;  %v221_v29 = vld [vmem:[#allocation8] sm:$0xff]  ;;  %v224_v40 = vld [vmem:[#allocation8 + $0x18] sm:$0xff]  ;;  %v157_v46 = vld [vmem:[#allocation5 + $0x30] sm:$0xff] }
  0x1b   :  { %v185_v47 = vld [vmem:[#allocation7 + $0x30] sm:$0xff]  ;;  %v171_v49 = vmul.f32 %v157_v46, %v506_v8  ;;  %v227_v51 = vld [vmem:[#allocation8 + $0x30] sm:$0xff]  ;;  %v160_v57 = vld [vmem:[#allocation5 + $0x48] sm:$0xff] }
  0x1c   :  { %105 = vrot.lane.b32.xlu2 %v496_v3, %s441_s3  ;;  %101 = vrot.lane.b32.xlu1 %v84_v4, %s441_s3  ;;  %v188_v58 = vld [vmem:[#allocation7 + $0x48] sm:$0xff]  ;;  %v174_v60 = vmul.f32 %v160_v57, %v515_v11  ;;  %v230_v62 = vld [vmem:[#allocation8 + $0x48] sm:$0xff] }
  0x1d   :  { %97 = vrot.lane.b32.xlu0 %v498_v5, %s441_s3  ;;  %v158_v57 = vld [vmem:[#allocation5 + $0x38] sm:$0xff] }
  0x24   :  { %111 = vrot.lane.b32.xlu2 %v502_v6, %s441_s3  ;;  %109 = vrot.lane.b32.xlu1 %v504_v7, %s441_s3 }
  0x25   :  { %107 = vrot.lane.b32.xlu0 %v506_v8, %s441_s3 }
  0x2c   :  { %117 = vrot.lane.b32.xlu2 %v511_v9, %s441_s3  ;;  %115 = vrot.lane.b32.xlu1 %v513_v10, %s441_s3 }
  0x2d   :  { %113 = vrot.lane.b32.xlu0 %v515_v11, %s441_s3 }
  0x34   :  { %121 = vrot.lane.b32.xlu1 %v520_v12, %s441_s3  ;;  %123 = vrot.lane.b32.xlu2 %v81_v2, %s442_s8  ;;  %v153_v2 = vld [vmem:[#allocation5 + $0x10] sm:$0xff] }
  0x35   :  { %119 = vrot.lane.b32.xlu0 %v522_v13, %s441_s3 }
  0x3c   :  { %127 = vrot.lane.b32.xlu1 %v493_v1, %s442_s8  ;;  %129 = vrot.lane.b32.xlu2 %v84_v4, %s442_s8 }
  0x3d   :  { %125 = vrot.lane.b32.xlu0 %v498_v5, %s442_s8 }
  0x44   :  { %133 = vrot.lane.b32.xlu1 %v496_v3, %s442_s8  ;;  %135 = vrot.lane.b32.xlu2 %v506_v8, %s442_s8 }
  0x45   :  { %131 = vrot.lane.b32.xlu0 %v85_v0, %s442_s8 }
  0x4c   :  { %139 = vrot.lane.b32.xlu1 %v502_v6, %s442_s8  ;;  %141 = vrot.lane.b32.xlu2 %v515_v11, %s442_s8 }
  0x4d   :  { %137 = vrot.lane.b32.xlu0 %v504_v7, %s442_s8 }
  0x54   :  { %145 = vrot.lane.b32.xlu1 %v511_v9, %s442_s8  ;;  %147 = vrot.lane.b32.xlu2 %v522_v13, %s442_s8 }
  0x55   :  { %143 = vrot.lane.b32.xlu0 %v513_v10, %s442_s8 }
  0x5d   :  { %149 = vrot.lane.b32.xlu0 %v520_v12, %s442_s8 }
  0x6e   :  { %v104_v17 = vpop.permute.xlu2 %103 }
  0x6f   :  { %v197_v18 = vmul.f32 %v183_v15, %v104_v17  ;;  %v163_v15 = vld [vmem:[#allocation5 + $0x60] sm:$0xff]  ;;  %v191_v17 = vld [vmem:[#allocation7 + $0x60] sm:$0xff] }
  0x70   :  { %v177_v11 = vmul.f32 %v163_v15, %v522_v13 }
  0x71   :  { %v537_v19 = vadd.f32 %v197_v18, %v169_v16  ;;  %v181_v16 = vld [vmem:[#allocation7 + $0x10] sm:$0xff]  ;;  %v152_v18 = vld [vmem:[#allocation5 + $0x8] sm:$0xff] }
  0x76   :  { %v539_v20 = vpop.permute.xlu2 %105 }
  0x7e   :  { %v541_v21 = vpop.permute.xlu2 %111 }
  0x86   :  { %v543_v22 = vpop.permute.xlu2 %117  ;;  %v100_v23 = vpop.permute.xlu1 %99 }
  0x87   :  { %v96_v24 = vpop.permute.xlu0 %95 }
  0x88   :  { %v193_v28 = vmul.f32 %v179_v26, %v96_v24  ;;  %v180_v24 = vld [vmem:[#allocation7 + $0x8] sm:$0xff]  ;;  %v167_v26 = vmul.f32 %v153_v2, %v493_v1 }
  0x89   :  { %v184_v1 = vld [vmem:[#allocation7 + $0x28] sm:$0xff] }
  0x8a   :  { %v207_v34 = vadd.f32 %v193_v28, %v165_v27  ;;  %v195_v27 = vmul.f32 %v181_v16, %v100_v23  ;;  %v228_v2 = vld [vmem:[#allocation8 + $0x38] sm:$0xff] }
  0x8b   :  { %v162_v16 = vld [vmem:[#allocation5 + $0x58] sm:$0xff] }
  0x8e   :  { %v102_v32 = vpop.permute.xlu1 %101  ;;  %v124_v33 = vpop.permute.xlu2 %123 }
  0x8f   :  { %v235_v35 = vmul.f32 %v221_v29, %v124_v33  ;;  %v98_v36 = vpop.permute.xlu0 %97  ;;  %v196_v38 = vmul.f32 %v182_v31, %v102_v32  ;;  %v166_v29 = vmul.f32 %v152_v18, %v498_v5  ;;  %v223_v31 = vld [vmem:[#allocation8 + $0x10] sm:$0xff]  ;;  %v233_v32 = vld [vmem:[#allocation8 + $0x60] sm:$0xff]  ;;  %v222_v33 = vld [vmem:[#allocation8 + $0x8] sm:$0xff] }
  0x90   :  { %v194_v30 = vmul.f32 %v180_v24, %v98_v36  ;;  %v198_v36 = vmul.f32 %v184_v1, %v539_v20  ;;  %v161_v24 = vld [vmem:[#allocation5 + $0x50] sm:$0xff] }
  0x91   :  { %v249_v39 = vadd.f32 %v235_v35, %v207_v34  ;;  %v210_v41 = vadd.f32 %v196_v38, %v168_v37  ;;  %v209_v37 = vadd.f32 %v195_v27, %v167_v26  ;;  %v176_v26 = vmul.f32 %v162_v16, %v511_v9  ;;  %v232_v27 = vld [vmem:[#allocation8 + $0x58] sm:$0xff] }
  0x93   :  { %263 = vst [vmem:[#allocation10] sm:$0xff] %v249_v39 }
  0x96   :  { %v545_v42 = vpop.permute.xlu1 %109  ;;  %v130_v43 = vpop.permute.xlu2 %129 }
  0x97   :  { %v238_v44 = vmul.f32 %v224_v40, %v130_v43  ;;  %v108_v45 = vpop.permute.xlu0 %107  ;;  %v156_v43 = vld [vmem:[#allocation5 + $0x28] sm:$0xff] }
  0x98   :  { %v199_v50 = vmul.f32 %v185_v47, %v108_v45  ;;  %v170_v5 = vmul.f32 %v156_v43, %v496_v3  ;;  %v226_v47 = vld [vmem:[#allocation8 + $0x28] sm:$0xff] }
  0x99   :  { %v252_v48 = vadd.f32 %v238_v44, %v210_v41  ;;  %v208_v44 = vadd.f32 %v194_v30, %v166_v29 }
  0x9a   :  { %v213_v54 = vadd.f32 %v199_v50, %v171_v49  ;;  %v212_v50 = vadd.f32 %v198_v36, %v170_v5 }
  0x9b   :  { %266 = vst [vmem:[#allocation10 + $0x18] sm:$0xff] %v252_v48  ;;  %v225_v48 = vld [vmem:[#allocation8 + $0x20] sm:$0xff] }
  0x9e   :  { %v548_v52 = vpop.permute.xlu1 %115  ;;  %v136_v53 = vpop.permute.xlu2 %135 }
  0x9f   :  { %v241_v55 = vmul.f32 %v227_v51, %v136_v53  ;;  %v114_v56 = vpop.permute.xlu0 %113 }
  0xa0   :  { %v202_v61 = vmul.f32 %v188_v58, %v114_v56  ;;  %v186_v58 = vld [vmem:[#allocation7 + $0x38] sm:$0xff] }
  0xa1   :  { %v255_v59 = vadd.f32 %v241_v55, %v213_v54  ;;  %v159_v54 = vld [vmem:[#allocation5 + $0x40] sm:$0xff]  ;;  %v187_v55 = vld [vmem:[#allocation7 + $0x40] sm:$0xff] }
  0xa2   :  { %v216_v4 = vadd.f32 %v202_v61, %v174_v60  ;;  %v173_v3 = vmul.f32 %v159_v54, %v502_v6  ;;  %v201_v20 = vmul.f32 %v187_v55, %v541_v21  ;;  %v172_v61 = vmul.f32 %v158_v57, %v504_v7  ;;  %v189_v6 = vld [vmem:[#allocation7 + $0x50] sm:$0xff] }
  0xa3   :  { %269 = vst [vmem:[#allocation10 + $0x30] sm:$0xff] %v255_v59 }
  0xa6   :  { %v551_v63 = vpop.permute.xlu1 %121  ;;  %v142_v0 = vpop.permute.xlu2 %141 }
  0xa7   :  { %v244_v8 = vmul.f32 %v230_v62, %v142_v0  ;;  %v120_v14 = vpop.permute.xlu0 %119  ;;  %v200_v62 = vmul.f32 %v186_v58, %v545_v42  ;;  %v229_v0 = vld [vmem:[#allocation8 + $0x40] sm:$0xff]  ;;  %v175_v42 = vmul.f32 %v161_v24, %v513_v10 }
  0xa8   :  { %v205_v28 = vmul.f32 %v191_v17, %v120_v14  ;;  %v190_v17 = vld [vmem:[#allocation7 + $0x58] sm:$0xff] }
  0xa9   :  { %v258_v25 = vadd.f32 %v244_v8, %v216_v4  ;;  %v215_v8 = vadd.f32 %v201_v20, %v173_v3  ;;  %v214_v18 = vadd.f32 %v200_v62, %v172_v61  ;;  %v204_v7 = vmul.f32 %v190_v17, %v543_v22 }
  0xaa   :  { %v219_v38 = vadd.f32 %v205_v28, %v177_v11  ;;  %v203_v11 = vmul.f32 %v189_v6, %v548_v52  ;;  %v231_v28 = vld [vmem:[#allocation8 + $0x50] sm:$0xff]  ;;  %v234_v52 = vld [vmem:[#allocation8 + $0x68] sm:$0xff] }
  0xab   :  { %272 = vst [vmem:[#allocation10 + $0x48] sm:$0xff] %v258_v25  ;;  %v218_v30 = vadd.f32 %v204_v7, %v176_v26 }
  0xae   :  { %v128_v34 = vpop.permute.xlu1 %127  ;;  %v148_v35 = vpop.permute.xlu2 %147 }
  0xaf   :  { %v237_v39 = vmul.f32 %v223_v31, %v128_v34  ;;  %v247_v40 = vmul.f32 %v233_v32, %v148_v35  ;;  %v126_v41 = vpop.permute.xlu0 %125  ;;  %v164_v35 = vld [vmem:[#allocation5 + $0x68] sm:$0xff] }
  0xb0   :  { %v236_v13 = vmul.f32 %v222_v33, %v126_v41  ;;  %v217_v33 = vadd.f32 %v203_v11, %v175_v42  ;;  %v178_v22 = vmul.f32 %v164_v35, %v520_v12 }
  0xb1   :  { %v251_v23 = vadd.f32 %v237_v39, %v209_v37  ;;  %v261_v45 = vadd.f32 %v247_v40, %v219_v38  ;;  %v192_v37 = vld [vmem:[#allocation7 + $0x68] sm:$0xff] }
  0xb2   :  { %v250_v46 = vadd.f32 %v236_v13, %v208_v44  ;;  %v206_v10 = vmul.f32 %v192_v37, %v551_v63 }
  0xb3   :  { %265 = vst [vmem:[#allocation10 + $0x10] sm:$0xff] %v251_v23 }
  0xb4   :  { %275 = vst [vmem:[#allocation10 + $0x60] sm:$0xff] %v261_v45  ;;  %v220_v40 = vadd.f32 %v206_v10, %v178_v22 }
  0xb5   :  { %264 = vst [vmem:[#allocation10 + $0x8] sm:$0xff] %v250_v46 }
  0xb6   :  { %v134_v49 = vpop.permute.xlu1 %133 }
  0xb7   :  { %v240_v51 = vmul.f32 %v226_v47, %v134_v49  ;;  %v132_v53 = vpop.permute.xlu0 %131 }
  0xb8   :  { %v239_v56 = vmul.f32 %v225_v48, %v132_v53 }
  0xb9   :  { %v254_v59 = vadd.f32 %v240_v51, %v212_v50 }
  0xba   :  { %v253_v60 = vadd.f32 %v239_v56, %v537_v19 }
  0xbb   :  { %268 = vst [vmem:[#allocation10 + $0x28] sm:$0xff] %v254_v59 }
  0xbc   :  { %267 = vst [vmem:[#allocation10 + $0x20] sm:$0xff] %v253_v60 }
  0xbe   :  { %v140_v4 = vpop.permute.xlu1 %139 }
  0xbf   :  { %v243_v14 = vmul.f32 %v229_v0, %v140_v4  ;;  %v138_v15 = vpop.permute.xlu0 %137 }
  0xc0   :  { %v242_v19 = vmul.f32 %v228_v2, %v138_v15 }
  0xc1   :  { %v257_v25 = vadd.f32 %v243_v14, %v215_v8 }
  0xc2   :  { %v256_v21 = vadd.f32 %v242_v19, %v214_v18 }
  0xc3   :  { %271 = vst [vmem:[#allocation10 + $0x40] sm:$0xff] %v257_v25 }
  0xc4   :  { %270 = vst [vmem:[#allocation10 + $0x38] sm:$0xff] %v256_v21 }
  0xc6   :  { %v146_v29 = vpop.permute.xlu1 %145 }
  0xc7   :  { %v246_v31 = vmul.f32 %v232_v27, %v146_v29  ;;  %v144_v32 = vpop.permute.xlu0 %143 }
  0xc8   :  { %v245_v34 = vmul.f32 %v231_v28, %v144_v32 }
  0xc9   :  { %v260_v38 = vadd.f32 %v246_v31, %v218_v30 }
  0xca   :  { %v259_v9 = vadd.f32 %v245_v34, %v217_v33 }
  0xcb   :  { %274 = vst [vmem:[#allocation10 + $0x58] sm:$0xff] %v260_v38 }
  0xcc   :  { %273 = vst [vmem:[#allocation10 + $0x50] sm:$0xff] %v259_v9 }
  0xcf   :  { %v150_v39 = vpop.permute.xlu0 %149 }
  0xd0   :  { %v248_v41 = vmul.f32 %v234_v52, %v150_v39 }
  0xd2   :  { %v262_v43 = vadd.f32 %v248_v41, %v220_v40 }
  0xd4   :  { %276 = vst [vmem:[#allocation10 + $0x68] sm:$0xff] %v262_v43 }
  0xd5   :  { %289 = dma.vmem_to_hbm [thread:$0]  %s282_s10, 1792, %s284_s13, [#allocation4], %s436_s23, %s436_s23, %s437_s24  }
  0xd6   :  { %433 = dma.done.wait [#allocation4], 1792  }
  0xd7   :  { %434 = vsyncadd [#allocation4], 4294965504 }
  0xd8   :  { %294 = vsyncpa [#allocation3], 1 }
  0xd9   :  { %295 = vsyncpa [#allocation6], 1 }
  0xda   :  { %296 = vsyncpa [#allocation9], 1 }
  0xdb   :  { %297 = vsyncpa [#allocation4], 1 }

</bundles_post_ra>
